<compile_context>
chip_gen: v5e
topology: v5e:2x2
jax: 0.10.0
libtpu: 0.0.40
codegen_flags: <defaults>
</compile_context>

<pallas_src>
import functools

import jax
import jax.numpy as jnp
from jax import lax
from jax.experimental import pallas as pl
from jax.experimental.pallas import tpu as pltpu

_MiB = 1024 * 1024


# ----------------------------------------------------------------------------
# VMEM / tiling planning (generation-aware)
# ----------------------------------------------------------------------------
def _vmem_plan(resident_bytes):
    """Returns (vmem_limit_bytes, block_budget_bytes, two_tensorcores).

    resident_bytes: VMEM consumed by blocks that do not scale with the batch
    tile (the double-buffered, constant-index weight blocks).
    """
    try:
        cap = int(pltpu.get_tpu_info().vmem_capacity_bytes)
    except Exception:  # unknown target / interpret mode: be conservative
        cap = 64 * _MiB  # v7x per-TensorCore capacity
    # Leave headroom for Mosaic-internal scratch / semaphores:
    #   v7x (64 MiB/TC) -> 48 MiB declared limit; v5e/v6e (128 MiB) -> 112 MiB.
    vmem_limit = max(cap - 16 * _MiB, cap // 2)
    block_budget = max(vmem_limit - resident_bytes - 2 * _MiB, _MiB)
    # v7x is the only supported generation with <=64 MiB per core and two
    # TensorCores sharing the grid ("parallel" axes are split across them).
    two_tc = cap <= 64 * _MiB
    return vmem_limit, block_budget, two_tc


def _min_grid_steps(n, two_tc):
    if not two_tc:
        return 1            # single TensorCore: bigger tiles beat step count
    if n >= 4:
        return 4            # >=2 steps per core: keeps per-core DMA pipelined
    if n >= 2:
        return 2
    return 1


def _largest_divisor_leq(n, cap):
    cap = max(1, min(int(cap), n))
    best = 1
    for d in range(1, cap + 1):
        if n % d == 0:
            best = d
    return best


def _batch_tile(n, per_row_bytes, budget_bytes, min_steps):
    cap = max(1, budget_bytes // max(per_row_bytes, 1))
    if min_steps > 1:
        cap = min(cap, max(1, n // min_steps))
    return _largest_divisor_leq(n, cap)


# ----------------------------------------------------------------------------
# Kernels
# ----------------------------------------------------------------------------
def _se_fused_kernel(x_ref, w1_ref, w2_ref, o_ref, *, hw):
    """Single-pass SE for an NCHW (bt, C, HW) block that fits VMEM."""
    x = x_ref[...]                                                 # native dtype
    # Squeeze: f32 accumulation only for the tiny (bt, C) result.
    # TODO(synk): verify via pl.lower_as_mlir that this does not materialize a
    # full f32 copy of the tile for bf16 inputs; if it does, reduce in lane
    # chunks with a fori_loop accumulating into a (bt, C) f32 vreg.
    pooled = jnp.sum(x, axis=-1, dtype=jnp.float32) * (1.0 / hw)   # (bt, C)
    # Excitation: fc1 -> relu -> fc2 -> sigmoid, contracting stored weights
    # directly (no wrapper transposes).
    s1 = jnp.maximum(
        lax.dot_general(pooled, w1_ref[...].astype(jnp.float32),
                        (((1,), (1,)), ((), ())),
                        preferred_element_type=jnp.float32), 0.0)  # (bt, Cr)
    s2 = jax.nn.sigmoid(
        lax.dot_general(s1, w2_ref[...].astype(jnp.float32),
                        (((1,), (1,)), ((), ())),
                        preferred_element_type=jnp.float32))       # (bt, C)
    # Scale: fuse cast + channel-wise multiply into the single store.
    o_ref[...] = x * s2.astype(o_ref.dtype)[:, :, None]


def _se_fused_nhwc_kernel(x_ref, w1_ref, w2_ref, o_ref, *, hw):
    """Single-pass SE for a channels-last (bt, HW, C) block (lane-dense)."""
    x = x_ref[...]
    pooled = jnp.sum(x, axis=1, dtype=jnp.float32) * (1.0 / hw)    # (bt, C)
    s1 = jnp.maximum(
        lax.dot_general(pooled, w1_ref[...].astype(jnp.float32),
                        (((1,), (1,)), ((), ())),
                        preferred_element_type=jnp.float32), 0.0)
    s2 = jax.nn.sigmoid(
        lax.dot_general(s1, w2_ref[...].astype(jnp.float32),
                        (((1,), (1,)), ((), ())),
                        preferred_element_type=jnp.float32))
    o_ref[...] = x * s2.astype(o_ref.dtype)[:, None, :]


def _se_pool_excite_kernel(x_ref, w1_ref, w2_ref, s2_ref, acc_ref,
                           *, hw, hw_tile, mask_tail):
    """Pass 1 of the HW-tiled fallback: pool + excitation -> s2 (bt, C, 1)."""
    h = pl.program_id(1)

    x = x_ref[...]                                                 # (bt, C, hw_t)
    if mask_tail:
        idx = lax.broadcasted_iota(jnp.int32, x.shape, 2) + h * hw_tile
        x = jnp.where(idx < hw, x, jnp.zeros_like(x))
    part = jnp.sum(x, axis=-1, dtype=jnp.float32)                  # (bt, C)

    @pl.when(h == 0)
    def _():
        acc_ref[...] = jnp.zeros_like(acc_ref)

    acc_ref[...] += part

    @pl.when(h == pl.num_programs(1) - 1)
    def _():
        pooled = acc_ref[...] * (1.0 / hw)
        s1 = jnp.maximum(
            lax.dot_general(pooled, w1_ref[...].astype(jnp.float32),
                            (((1,), (1,)), ((), ())),
                            preferred_element_type=jnp.float32), 0.0)
        s2 = jax.nn.sigmoid(
            lax.dot_general(s1, w2_ref[...].astype(jnp.float32),
                            (((1,), (1,)), ((), ())),
                            preferred_element_type=jnp.float32))
        s2_ref[...] = s2[:, :, None]                               # (bt, C, 1) f32


def _se_scale_kernel(x_ref, s2_ref, o_ref):
    """Pass 2 of the HW-tiled fallback: out = x * s2 (s2 resident per b tile)."""
    scale = s2_ref[...].astype(o_ref.dtype)                        # (bt, C, 1)
    o_ref[...] = x_ref[...] * scale


# ----------------------------------------------------------------------------
# Wrappers
# ----------------------------------------------------------------------------
def se_module(x_nchw, w1, w2, *, split_hw_tile=None):
    """SEModule forward (NCHW, matching the PyTorch module).

    x_nchw: (N, C, H, W)
    w1:     (C//r, C)  -- fc1 1x1-conv weight (squeezed from (C//r, C, 1, 1))
    w2:     (C, C//r)  -- fc2 1x1-conv weight (squeezed from (C, C//r, 1, 1))
    split_hw_tile: force the HW-tiled two-pass path with this lane tile
                   (testing/override); must be a multiple of 128 or == H*W.
    """
    N, C, H, W = x_nchw.shape
    HW = H * W
    Cr = w1.shape[0]
    assert w1.shape == (Cr, C) and w2.shape == (C, Cr)

    # Free reshape (no data movement): NCHW -> (N, C, HW).  We deliberately do
    # NOT transpose to channels-last here (extra HBM round trip); callers that
    # already have NHWC should use se_module_channels_last for lane-dense
    # stores when HW is not a multiple of 128.
    x = x_nchw.reshape(N, C, HW)
    isz = x.dtype.itemsize

    # Weights stay resident (constant index_map) but are double-buffered by
    # the default pipeline -> charge 2x against the budget.
    w_resident = 2 * (w1.size * w1.dtype.itemsize + w2.size * w2.dtype.itemsize)
    vmem_limit, budget, two_tc = _vmem_plan(w_resident)
    min_steps = _min_grid_steps(N, two_tc)

    per_row_fused = 4 * C * HW * isz        # (in + out) blocks, double-buffered

    if split_hw_tile is None and per_row_fused <= budget:
        # ---------------- Fused single-pass path ----------------
        bt = _batch_tile(N, per_row_fused, budget, min_steps)
        out = pl.pallas_call(
            functools.partial(_se_fused_kernel, hw=HW),
            out_shape=jax.ShapeDtypeStruct((N, C, HW), x.dtype),
            grid_spec=pltpu.PrefetchScalarGridSpec(
                num_scalar_prefetch=0,
                grid=(N // bt,),
                in_specs=[
                    pl.BlockSpec((bt, C, HW), lambda b: (b, 0, 0)),
                    pl.BlockSpec((Cr, C), lambda b: (0, 0)),
                    pl.BlockSpec((C, Cr), lambda b: (0, 0)),
                ],
                out_specs=pl.BlockSpec((bt, C, HW), lambda b: (b, 0, 0)),
            ),
            compiler_params=pltpu.CompilerParams(
                dimension_semantics=("parallel",),
                vmem_limit_bytes=vmem_limit,
            ),
        )(x, w1, w2)
        return out.reshape(N, C, H, W)

    # ---------------- HW-tiled two-pass fallback ----------------
    if split_hw_tile is not None:
        hw_t = int(split_hw_tile)
    else:
        hw_t = min(HW, budget // (4 * C * isz))
        hw_t = max(128, (hw_t // 128) * 128)
        # TODO(synk): if even a 128-lane slab of all C channels exceeds the
        # budget (enormous C), a C-tiled pool would be needed as well.
    if hw_t >= HW:
        hw_t = HW
    assert hw_t == HW or hw_t % 128 == 0, "HW tile must be 128-aligned"

    n_hw = pl.cdiv(HW, hw_t)
    mask_tail = (HW % hw_t) != 0

    per_row_split = 4 * C * hw_t * isz
    bt = _batch_tile(N, per_row_split, budget, min_steps)

    # Pass 1: pool + excitation -> s2 of shape (N, C, 1), f32.
    s2 = pl.pallas_call(
        functools.partial(_se_pool_excite_kernel,
                          hw=HW, hw_tile=hw_t, mask_tail=mask_tail),
        out_shape=jax.ShapeDtypeStruct((N, C, 1), jnp.float32),
        grid_spec=pltpu.PrefetchScalarGridSpec(
            num_scalar_prefetch=0,
            grid=(N // bt, n_hw),
            in_specs=[
                pl.BlockSpec((bt, C, hw_t), lambda b, h: (b, 0, h)),
                pl.BlockSpec((Cr, C), lambda b, h: (0, 0)),
                pl.BlockSpec((C, Cr), lambda b, h: (0, 0)),
            ],
            out_specs=pl.BlockSpec((bt, C, 1), lambda b, h: (b, 0, 0)),
            scratch_shapes=[pltpu.VMEM((bt, C), jnp.float32)],
        ),
        compiler_params=pltpu.CompilerParams(
            dimension_semantics=("parallel", "arbitrary"),
            vmem_limit_bytes=vmem_limit,
        ),
    )(x, w1, w2)

    # Pass 2: re-stream x in lane-dense hw_t-wide tiles and scale.
    out = pl.pallas_call(
        _se_scale_kernel,
        out_shape=jax.ShapeDtypeStruct((N, C, HW), x.dtype),
        grid_spec=pltpu.PrefetchScalarGridSpec(
            num_scalar_prefetch=0,
            grid=(N // bt, n_hw),
            in_specs=[
                pl.BlockSpec((bt, C, hw_t), lambda b, h: (b, 0, h)),
                pl.BlockSpec((bt, C, 1), lambda b, h: (b, 0, 0)),
            ],
            out_specs=pl.BlockSpec((bt, C, hw_t), lambda b, h: (b, 0, h)),
        ),
        compiler_params=pltpu.CompilerParams(
            dimension_semantics=("parallel", "parallel"),
            vmem_limit_bytes=vmem_limit,
        ),
    )(x, s2)
    return out.reshape(N, C, H, W)


def se_module_channels_last(x_nhwc, w1, w2):
    """SEModule forward for channels-last inputs (N, H, W, C): lane-dense
    stores when C is a multiple of 128 (the big measured lever for mem-bound
    kernels).  Same math/weights as se_module."""
    N, H, W, C = x_nhwc.shape
    HW = H * W
    Cr = w1.shape[0]
    x = x_nhwc.reshape(N, HW, C)
    isz = x.dtype.itemsize

    w_resident = 2 * (w1.size * w1.dtype.itemsize + w2.size * w2.dtype.itemsize)
    vmem_limit, budget, two_tc = _vmem_plan(w_resident)
    min_steps = _min_grid_steps(N, two_tc)

    per_row = 4 * HW * C * isz
    # TODO(synk): add an HW-tiled (sublane-axis) fallback for channels-last
    # when a single (1, HW, C) block exceeds the VMEM budget.
    bt = _batch_tile(N, per_row, budget, min_steps)

    out = pl.pallas_call(
        functools.partial(_se_fused_nhwc_kernel, hw=HW),
        out_shape=jax.ShapeDtypeStruct((N, HW, C), x.dtype),
        grid_spec=pltpu.PrefetchScalarGridSpec(
            num_scalar_prefetch=0,
            grid=(N // bt,),
            in_specs=[
                pl.BlockSpec((bt, HW, C), lambda b: (b, 0, 0)),
                pl.BlockSpec((Cr, C), lambda b: (0, 0)),
                pl.BlockSpec((C, Cr), lambda b: (0, 0)),
            ],
            out_specs=pl.BlockSpec((bt, HW, C), lambda b: (b, 0, 0)),
        ),
        compiler_params=pltpu.CompilerParams(
            dimension_semantics=("parallel",),
            vmem_limit_bytes=vmem_limit,
        ),
    )(x, w1, w2)
    return out.reshape(N, H, W, C)


# ----------------------------------------------------------------------------
# Reference + tests
# ----------------------------------------------------------------------------
def _se_reference(x, w1, w2):
    pooled = jnp.mean(x, axis=(2, 3))                        # (N, C)
    s1 = jnp.maximum(pooled @ w1.T, 0.0)                     # (N, C//r)
    s2 = jax.nn.sigmoid(s1 @ w2.T)                           # (N, C)
    return x * s2[:, :, None, None]


if __name__ == "__main__":
    key = jax.random.PRNGKey(0)
    kx, k1, k2, kx2, k3, k4 = jax.random.split(key, 6)

    # 1) Fused single-pass path (block fits VMEM), NCHW.
    N, C, H, W = 2, 4, 16, 16
    reduction = 2
    Cr = C // reduction
    x = jax.random.normal(kx, (N, C, H, W), dtype=jnp.float32)
    w1 = jax.random.normal(k1, (Cr, C), dtype=jnp.float32) * 0.1
    w2 = jax.random.normal(k2, (C, Cr), dtype=jnp.float32) * 0.1

    out = jax.block_until_ready(se_module(x, w1, w2))
    ref = _se_reference(x, w1, w2)
    assert out.shape == (N, C, H, W)
    assert jnp.allclose(out, ref, atol=1e-5, rtol=1e-5), "fused path mismatch"

    # 2) HW-tiled two-pass fallback, forced at small shapes, with a spatial
    #    extent that is NOT a multiple of 128 to exercise the tail mask and
    #    the partial-block output writes.
    N2, C2, H2, W2 = 2, 8, 13, 13
    Cr2 = C2 // 2
    x2 = jax.random.normal(kx2, (N2, C2, H2, W2), dtype=jnp.float32)
    w1b = jax.random.normal(k3, (Cr2, C2), dtype=jnp.float32) * 0.1
    w2b = jax.random.normal(k4, (C2, Cr2), dtype=jnp.float32) * 0.1

    out2 = jax.block_until_ready(se_module(x2, w1b, w2b, split_hw_tile=128))
    ref2 = _se_reference(x2, w1b, w2b)
    assert jnp.allclose(out2, ref2, atol=1e-5, rtol=1e-5), "split path mismatch"

    # 3) Channels-last entry point (transpose here is test harness only).
    x_nhwc = jnp.transpose(x, (0, 2, 3, 1))
    out3 = jax.block_until_ready(se_module_channels_last(x_nhwc, w1, w2))
    ref3 = jnp.transpose(ref, (0, 2, 3, 1))
    assert jnp.allclose(out3, ref3, atol=1e-5, rtol=1e-5), "NHWC path mismatch"

    print("KERNEL_OK")
</pallas_src>

<mosaic_0001>
module attributes {stable_mosaic.version = 11 : i64} {
  func.func @_se_fused_kernel(%arg0: i32, %arg1: memref<1x4x256xf32, #tpu.memory_space<vmem>>, %arg2: memref<2x4xf32, #tpu.memory_space<vmem>>, %arg3: memref<4x2xf32, #tpu.memory_space<vmem>>, %arg4: memref<1x4x256xf32, #tpu.memory_space<vmem>>) attributes {dimension_semantics = [#tpu.dimension_semantics<parallel>], iteration_bounds = array<i64: 2>, scalar_prefetch = 0 : i64, scratch_operands = 0 : i64, tpu.core_type = #tpu.core_type<tc>, window_params = [{transform_indices = @transform_0, window_bounds = array<i64: 1, 4, 256>}, {pipeline_mode = #tpu.pipeline_mode<synchronous>, transform_indices = @transform_1, window_bounds = array<i64: 2, 4>}, {pipeline_mode = #tpu.pipeline_mode<synchronous>, transform_indices = @transform_2, window_bounds = array<i64: 4, 2>}, {transform_indices = @transform_3, window_bounds = array<i64: 1, 4, 256>}]} {
    %c0 = arith.constant 0 : index
    %c0_0 = arith.constant 0 : index
    %c0_1 = arith.constant 0 : index
    %0 = vector.load %arg1[%c0, %c0_0, %c0_1] : memref<1x4x256xf32, #tpu.memory_space<vmem>>, vector<1x4x256xf32>
    %cst = arith.constant dense<0.000000e+00> : vector<1x4xf32>
    %1 = vector.multi_reduction <add>, %0, %cst [2] : vector<1x4x256xf32> to vector<1x4xf32>
    %cst_2 = arith.constant 3.906250e-03 : f32
    %2 = vector.broadcast %cst_2 : f32 to vector<1x4xf32>
    %3 = arith.mulf %1, %2 : vector<1x4xf32>
    %c0_3 = arith.constant 0 : index
    %c0_4 = arith.constant 0 : index
    %4 = vector.load %arg2[%c0_3, %c0_4] : memref<2x4xf32, #tpu.memory_space<vmem>>, vector<2x4xf32>
    %cst_5 = arith.constant dense<0.000000e+00> : vector<1x2xf32>
    %5 = tpu.matmul %3, %4, %cst_5 {dimension_numbers = #tpu.dot_dimension_numbers<[1], [1], [0], [0], [0, 0, 1, 0], [], []>} : vector<1x4xf32>, vector<2x4xf32>, vector<1x2xf32> -> vector<1x2xf32>
    %cst_6 = arith.constant 0.000000e+00 : f32
    %6 = vector.broadcast %cst_6 : f32 to vector<1x2xf32>
    %7 = arith.maximumf %5, %6 : vector<1x2xf32>
    %c0_7 = arith.constant 0 : index
    %c0_8 = arith.constant 0 : index
    %8 = vector.load %arg3[%c0_7, %c0_8] : memref<4x2xf32, #tpu.memory_space<vmem>>, vector<4x2xf32>
    %cst_9 = arith.constant dense<0.000000e+00> : vector<1x4xf32>
    %9 = tpu.matmul %7, %8, %cst_9 {dimension_numbers = #tpu.dot_dimension_numbers<[1], [1], [0], [0], [0, 0, 1, 0], [], []>} : vector<1x2xf32>, vector<4x2xf32>, vector<1x4xf32> -> vector<1x4xf32>
    %10 = arith.negf %9 : vector<1x4xf32>
    %11 = math.exp %10 : vector<1x4xf32>
    %cst_10 = arith.constant 1.000000e+00 : f32
    %12 = vector.broadcast %cst_10 : f32 to vector<1x4xf32>
    %13 = arith.addf %12, %11 : vector<1x4xf32>
    %14 = arith.divf %12, %13 : vector<1x4xf32>
    %15 = vector.shape_cast %14 : vector<1x4xf32> to vector<1x4x1xf32>
    %16 = vector.broadcast %15 : vector<1x4x1xf32> to vector<1x4x256xf32>
    %17 = arith.mulf %0, %16 : vector<1x4x256xf32>
    %c0_11 = arith.constant 0 : index
    %c0_12 = arith.constant 0 : index
    %c0_13 = arith.constant 0 : index
    %18 = vector.load %arg4[%c0_11, %c0_12, %c0_13] : memref<1x4x256xf32, #tpu.memory_space<vmem>>, vector<1x4x256xf32>
    tpu.vector_store %arg4[%c0_11, %c0_12, %c0_13], %17 {strides = array<i32>} : memref<1x4x256xf32, #tpu.memory_space<vmem>>, vector<1x4x256xf32>,
    return
  }
  func.func @transform_0(%arg0: i32) -> (i32, i32, i32) {
    %c0_i32 = arith.constant 0 : i32
    %c0_i32_0 = arith.constant 0 : i32
    %c0_i32_1 = arith.constant 0 : i32
    return %arg0, %c0_i32, %c0_i32_0 : i32, i32, i32
  }
  func.func @transform_1(%arg0: i32) -> (i32, i32) {
    %c0_i32 = arith.constant 0 : i32
    %c0_i32_0 = arith.constant 0 : i32
    %c0_i32_1 = arith.constant 0 : i32
    return %c0_i32, %c0_i32_0 : i32, i32
  }
  func.func @transform_2(%arg0: i32) -> (i32, i32) {
    %c0_i32 = arith.constant 0 : i32
    %c0_i32_0 = arith.constant 0 : i32
    %c0_i32_1 = arith.constant 0 : i32
    return %c0_i32, %c0_i32_0 : i32, i32
  }
  func.func @transform_3(%arg0: i32) -> (i32, i32, i32) {
    %c0_i32 = arith.constant 0 : i32
    %c0_i32_0 = arith.constant 0 : i32
    %c0_i32_1 = arith.constant 0 : i32
    return %arg0, %c0_i32, %c0_i32_0 : i32, i32, i32
  }
}

</mosaic_0001>

<bundles_post_ra>
// kernel: tpu_custom_call.1
= control target key start
LH: loop header
LB: loop body
LE: loop exit
PB: predicated region body
PF: predicated region fallthrough
CT: control target
= control target key end

     0   :  { %8 = vsyncpa [#allocation3], 0  ;;  %s713_s0 = inlined_call_operand.hbm [shape: f32[2,4,256], index: 0, kind: input, shape index: {}]   ;;  %s714_s1 = inlined_call_operand.vmem [shape: f32[2,4], index: 1, kind: input, shape index: {}]   ;;  %s715_s2 = inlined_call_operand.vmem [shape: f32[4,2], index: 2, kind: input, shape index: {}]   ;;  %s716_s3 = inlined_call_operand.hbm [shape: f32[2,4,256], index: 3, kind: output, shape index: {}]  }
   0x1   :  { %10 = vsyncpa [#allocation3 + $0x1], 0 }
   0x2   :  { %11 = vsyncpa [#allocation4], 0 }
   0x3   :  { %13 = vsyncpa [#allocation4 + $0x1], 0  ;;  %s576_s12 = smov 0   ;;  %s578_s13 = smov 0  }
   0x4   :  { %s580_s14 = smov 0   ;;  %s582_s15 = smov 0  }
   0x5 LB: > { %s597_s16 = sadd.s32 4294967295, %s553_s15   ;;  %s384_s17 = sadd.s32 4294967294, %s553_s15   ;;  %s553_s15 = sphi %s582_s15, %s726_s15   ;;  %s549_s14 = sphi %s580_s14, %s725_s14   ;;  %s545_s13 = sphi %s578_s13, %s724_s13   ;;  %s541_s12 = sphi %s576_s12, %s723_s12  }
   0x6   : > { %s601_s18 = sadd.s32 1, %s553_s15   ;;  %s26_s19 = sadd.s32 1, %s549_s14 }
   0x7   : > { %s23_s20 = ssub.s32 %s553_s15, %s601_s18  ;;  %p33_p0 = scmp.ne.s32.totalorder %s549_s14, %s545_s13 }
   0x8   : > { %p24_p1 = scmp.eq.s32.totalorder %s23_s20, 0  ;;  %p34_p2 = scmp.eq.s32.totalorder %s553_s15, 0 }
   0x9   : > { %p39_p3 = scmp.ne.s32.totalorder %s545_s13, %s541_s12  ;;  %p40_p4 = scmp.eq.s32.totalorder %s597_s16, 0 }
   0xa   : > { %s613_s21 = scalar_select %p24_p1, %s549_s14, %s26_s19  }
   0xb   : > { %p615_p5 = por %p34_p2, %p33_p0  ;;  %p619_p6 = por %p40_p4, %p39_p3 }
   0xc   : > { %p105_p7 = scmp.eq.s32.totalorder %s597_s16, 1  ;;  %p111_p8 = scmp.eq.s32.totalorder %s384_s17, 1 }
   0xd   : > { %p417_p10 = scmp.lt.s32.totalorder %s553_s15, 2  ;;  %s137_s26 = sand.u32 1, %s549_s14  }
   0xe   : > { %p626_p11 = por %p105_p7, %p33_p0  ;;  %p630_p12 = por %p111_p8, %p39_p3 }
   0xf   : > { %s403_s27 = sshll.u32 %s553_s15, 3  ;;  %s387_s28 = sshll.u32 %s137_s26, 3 }
  0x10   : > { %s146_s4 = scalar_lea.hbm %s713_s0, %s403_s27  ;;  %s141_s6 = scalar_lea.vmem [#allocation2], %s387_s28 }
  0x11   : > { %s148_s5 = sshll.u32 %s146_s4, 4  ;;  %s150_s7 = sshll.u32 %s141_s6, 4  ;;  %s149_s5 = int_to_ptr.hbm [resolvable:$true] %s148_s5  ;;  %s151_s7 = int_to_ptr.vmem [resolvable:$true] %s150_s7 }
  0x12   : > { %p641_p13 = pnand %p417_p10, %p615_p5  ;;  %p390_p0 = scmp.ge.s32.totalorder %s553_s15, 1 }
  0x13   : > { %p155_p1 = scmp.lt.s32.totalorder %s553_s15, 3  ;;  %s138_s9 = scalar_lea.sflag [#allocation3], %s137_s26 }
  0x14   : > { %s457_s10 = sshra.s32 %s149_s5, 4  ;;  %p461_p3 = pneg %p641_p13  ;;  %s458_s10 = int_to_ptr.hbm [resolvable:$true] %s457_s10 }
  0x15   : > { %s459_s11 = scalar_lea.hbm %s458_s10, 8  ;;  %s464_s20 = scalar_lea.hbm %s713_s0, 16 }
  0x16   : > { %p460_p2 = scmp.ne.s32.totalorder %s458_s10, %s459_s11  ;;  %p465_p5 = scmp.lt.s32.totalorder %s458_s10, %s713_s0 }
  0x17   : > { %p466_p8 = scmp.lt.s32.totalorder %s464_s20, %s459_s11 }
  0x18   : > { %p462_p4 = pnand %p461_p3, %p460_p2 }
  0x19   : > { %p467_p10 = por %p466_p8, %p465_p5 }
  0x1a   : > { %p463_p7 = pneg %p462_p4 }
  0x1c   : > { %p468_p9 = pnand %p467_p10, %p463_p7 }
  0x1e   : > { %471 = shalt.err (!%p468_p9)
}
  0x1f   : > { %412 = dma.hbm_to_vmem [thread:$0]  (!%p641_p13), %s149_s5, 128, %s151_s7, %s138_s9  }
  0x20   : > { %p156_p2 = pnand %p390_p0, %p155_p1 }
  0x21   : > { %s662_s26 = sand.u32 (!%p156_p2), 1, %s545_s13  }
  0x22   : > { %159 = sbr.rel (%p156_p2) target bundleno = 578 (0x242), region = 32  ;;  %s391_s28 = sshll.u32 (!%p156_p2), %s662_s26, 3 }
  0x23   : > { %s162_s29 = scalar_lea.sflag (!%p156_p2), [#allocation3], %s662_s26  ;;  %s165_s30 = scalar_lea.vmem (!%p156_p2), [#allocation2], %s391_s28 }
  0x27   : > { %532 = dma.done.wait (%p619_p6), %s162_s29, 128  }
  0x28   : > { %534 = vsyncadd (%p619_p6), %s162_s29, 4294967168  ;;  %v189_v0 = vld [vmem:[%s165_s30] sm:$0xff]  ;;  %vm196_vm0 = vcmask 1043456   ;;  %v203_v6 = vld [vmem:[%s714_s1] sm:$0x3]  ;;  %vm208_vm1 = vcmask 31744   ;;  %v205_v7 = vlaneseq }
  0x29   : > { %191 = vst [vmem:[#allocation1] ss:$2 sm:$0xff] %v189_v0  ;;  %393 = vmatpush.xpose.msk.msra.mxu0 %vm208_vm1, %v203_v6  ;;  %v235_v12 = vld [vmem:[%s715_s2] sm:$0xf]  ;;  %vm236_vm2 = vcmask 15360   ;;  %s404_s7 = sshll.u32 %s597_s16, 3 }
  0x2a   : > { %v206_v8 = vand.u32 127, %v205_v7  ;;  %395 = vmatpush.xpose.msk.msra.mxu1 %vm236_vm2, %v235_v12  ;;  %v284_v15 = vshrl.u32 %v205_v7, 7  ;;  %v555_v31 = vmov 839922192   ;;  %s309_s10 = scalar_lea.hbm %s716_s3, %s404_s7  ;;  %s188_s11 = scalar_lea.vmem [#allocation5], %s391_s28 }
  0x2b   : > { %v291_v32 = vunpack.c.l.s4 %v555_v31  ;;  %s311_s17 = sshll.u32 %s188_s11, 4  ;;  %s313_s19 = sshll.u32 %s309_s10, 4  ;;  %s312_s17 = int_to_ptr.vmem [resolvable:$true] %s311_s17  ;;  %s314_s19 = int_to_ptr.hbm [resolvable:$true] %s313_s19 }
  0x2c   : > { %452 = vset.pattern.permute.xlu0 %v284_v15  ;;  %s298_s20 = scalar_lea.sflag [#allocation4], %s662_s26  ;;  %s501_s22 = sshra.s32 %s314_s19, 4  ;;  %s502_s22 = int_to_ptr.hbm [resolvable:$true] %s501_s22 }
  0x2d   : > { %v292_v33 = vunpack.c.0.s8 %v291_v32  ;;  %s503_s16 = scalar_lea.hbm %s502_s22, 8  ;;  %s507_s30 = scalar_lea.hbm %s716_s3, 16 }
  0x2e   : > { %p504_p6 = scmp.ne.s32.totalorder %s502_s22, %s503_s16  ;;  %p508_p0 = scmp.lt.s32.totalorder %s502_s22, %s716_s3 }
  0x2f   : > { %p509_p1 = scmp.lt.s32.totalorder %s507_s30, %s503_s16 }
  0x30   : > { %v192_v1 = vld.sshfl [vmem:[#allocation1] sm:$0xff pattern:$0x75316420]  ;;  %v193_v2 = vld.sshfl [vmem:[#allocation1 + $0x8] sm:$0xff pattern:$0x75316420]  ;;  %p505_p9 = pnand %p504_p6, %p626_p11 }
  0x31   : > { %v197_v3 = vsel %vm196_vm0, %v192_v1, 0.0  ;;  %v198_v4 = vsel %vm196_vm0, %v193_v2, 0.0  ;;  %p510_p3 = por %p509_p1, %p508_p0 }
  0x32   : > { %v199_v5 = vadd.f32 %v198_v4, %v197_v3  ;;  %p506_p13 = pneg %p505_p9 }
  0x34   : > { %200 = vadd.xlane.f32.xlu0 %v199_v5  ;;  %p511_p4 = pnand %p510_p3, %p506_p13 }
  0xa7   : > { %v201_v9 = vpop.xlane.xlu0 %200 }
  0xa8   : > { %v202_v10 = vmul.f32 0.00390625, %v201_v9 }
  0xaa   : > { %v207_v11 = vperm.slane %v202_v10, %v206_v8 }
  0xac   : > { %394 = vmatmul.msk.f32.vlgmr.msra.gmra.mxu0 %vm208_vm1, %v207_v11 }
 0x129   : > { %v231_v13 = vpop.f32.mrf.mxu0 }
 0x12a   : > { %v234_v14 = vmax.f32 %v231_v13, 0.0 }
 0x12c   : > { %396 = vmatmul.msk.f32.vlgmr.msra.gmra.mxu1 %vm236_vm2, %v234_v14 }
 0x1a9   : > { %v260_v16 = vpop.f32.mrf.mxu1 }
 0x1aa   : > { %v397_v17 = vmul.f32 -1.442695, %v260_v16 }
 0x1ac   : > { %453 = vpow2.f32 %v397_v17 }
 0x1b2   : > { %v454_v18 = vpop.eup %453 }
 0x1b3   : > { %v266_v19 = vadd.f32 1.0, %v454_v18 }
 0x1b5   : > { %455 = vrcp.f32 %v266_v19  ;;  %v278_v23 = vand.u32 2147483648, %v266_v19  ;;  %v276_v25 = vand.u32 2147483647, %v266_v19  ;;  %vm272_vm4 = vweird.f32 %v266_v19 }
 0x1b7   : > { %v279_v27 = vor.u32 1.1754944e-38, %v278_v23  ;;  %vm277_vm6 = vcmp.eq.f32.partialorder %v276_v25, 8.507059e+37 }
 0x1bb   : > { %v456_v20 = vpop.eup %455 }
 0x1bc   : > { %v268_v21 = vmul.f32 %v456_v20, %v266_v19  ;;  %vm273_vm3 = vweird.f32 %v456_v20 }
 0x1bd   : > { %vm274_vm5 = vmor %vm272_vm4, %vm273_vm3 }
 0x1be   : > { %v269_v22 = vsub.f32 1.0, %v268_v21 }
 0x1c0   : > { %v270_v24 = vmul.f32 %v456_v20, %v269_v22 }
 0x1c2   : > { %v271_v26 = vadd.f32 %v456_v20, %v270_v24 }
 0x1c4   : > { %v275_v28 = vsel %vm274_vm5, %v456_v20, %v271_v26 }
 0x1c5   : > { %v280_v29 = vsel %vm277_vm6, %v279_v27, %v275_v28 }
 0x1c6   : > { %v282_v30 = vperm.slane %v280_v29, 0 }
 0x1c8   : > { %287 = vperm.xlu0 %452, %v282_v30  }
 0x23a   : > { %v288_v34 = vpop.permute.xlu0 %287 }
 0x23b   : > { %v293_v35 = vperm.slane %v288_v34, %v292_v33 }
 0x23d   : > { %v295_v36 = vmul.f32 %v293_v35, %v189_v0 }
 0x23f   : > { %296 = vst [vmem:[%s188_s11] sm:$0xff] %v295_v36 }
 0x240   : > { %514 = shalt.err (!%p511_p4)
}
 0x241   : > { %407 = dma.vmem_to_hbm [thread:$0]  (%p626_p11), %s312_s17, 128, %s314_s19, %s298_s20  }
 0x242 PF: > { %s325_s26 = sand.u32 1, %s541_s12   ;;  %p722_p7 = scmp.ge.s32.totalorder %s553_s15, 2 }
 0x243   : > { %s326_s5 = scalar_lea.sflag [#allocation4], %s325_s26 }
 0x244   : > { %p414_p5 = pnand %p722_p7, %p630_p12 }
 0x246   : > { %p415_p8 = pneg %p414_p5 }
 0x248   : > { %536 = dma.done.wait (%p415_p8), %s326_s5, 128  }
 0x249   : > { %538 = vsyncadd (%p415_p8), %s326_s5, 4294967168  ;;  %p16_p10 = scmp.ge.s32.totalorder %s601_s18, 4   ;;  %s723_s12 = smov %s545_s13 }
 0x24a   : > { %s724_s13 = smov %s549_s14  ;;  %s725_s14 = smov %s613_s21 }
 0x24b   : > { %s726_s15 = smov %s601_s18  ;;  %18 = sbr.rel (!%p16_p10) target bundleno = 5 (0x5), region = 77 }
 0x250   :  { %332 = vsyncpa [#allocation3], 1 }
 0x251   :  { %334 = vsyncpa [#allocation3 + $0x1], 1 }
 0x252   :  { %335 = vsyncpa [#allocation4], 1 }
 0x253   :  { %337 = vsyncpa [#allocation4 + $0x1], 1 }

</bundles_post_ra>
